<compile_context>
chip_gen: v5e
topology: v5e:2x2
jax: 0.10.0
libtpu: 0.0.40
codegen_flags: <defaults>
</compile_context>

<pallas_src>
import functools

import jax
import jax.numpy as jnp
from jax.experimental import pallas as pl
from jax.experimental.pallas import tpu as pltpu


def _round_up(x, m):
    return ((x + m - 1) // m) * m


# ---------------------------------------------------------------------------
# Kernel 1 (weight-first branch): h = (feat @ W) * src_norm   -> bf16 output
# ---------------------------------------------------------------------------
def _proj_kernel(feat_ref, w_ref, srcn_ref, out_ref):
    h = jnp.dot(feat_ref[...], w_ref[...], preferred_element_type=jnp.float32)
    out_ref[...] = (h * srcn_ref[...]).astype(out_ref.dtype)


def _project(feat_p, w_p, srcn_p, *, tile_n):
    n_pad, f_in_pad = feat_p.shape
    f_out_pad = w_p.shape[1]
    return pl.pallas_call(
        _proj_kernel,
        out_shape=jax.ShapeDtypeStruct((n_pad, f_out_pad), jnp.bfloat16),
        grid=(n_pad // tile_n,),
        in_specs=[
            pl.BlockSpec((tile_n, f_in_pad), lambda i: (i, 0)),
            pl.BlockSpec((f_in_pad, f_out_pad), lambda i: (0, 0)),
            pl.BlockSpec((tile_n, 1), lambda i: (i, 0)),
        ],
        out_specs=pl.BlockSpec((tile_n, f_out_pad), lambda i: (i, 0)),
        compiler_params=pltpu.CompilerParams(
            dimension_semantics=("parallel",),
            vmem_limit_bytes=32 * 1024 * 1024),
        cost_estimate=pl.CostEstimate(
            flops=2 * n_pad * f_in_pad * f_out_pad,
            transcendentals=0,
            bytes_accessed=4 * n_pad * f_in_pad + 4 * f_in_pad * f_out_pad
                           + 2 * n_pad * f_out_pad),
    )(feat_p, w_p, srcn_p)


# ---------------------------------------------------------------------------
# Kernel 2: tiled aggregation  out = relu(dst_norm * (A @ x) [@ W] + bias)
#   A tile : (TM, TK) bf16        x tile : (TK, Fx) bf16
#   acc    : (TM, Fx) f32 scratch, init at k==0, epilogue at k==last
# ---------------------------------------------------------------------------
def _agg_kernel(*refs, project, apply_relu):
    if project:
        adj_ref, x_ref, dstn_ref, w_ref, bias_ref, out_ref, acc_ref = refs
    else:
        adj_ref, x_ref, dstn_ref, bias_ref, out_ref, acc_ref = refs
        w_ref = None

    k = pl.program_id(1)

    @pl.when(k == 0)
    def _():
        acc_ref[...] = jnp.zeros_like(acc_ref)

    # Dominant matmul on the MXU: bf16 operands, f32 accumulation.
    acc_ref[...] += jnp.dot(adj_ref[...], x_ref[...],
                            preferred_element_type=jnp.float32)

    @pl.when(k == pl.num_programs(1) - 1)
    def _():
        r = acc_ref[...] * dstn_ref[...]          # dst-side normalization
        if project:                               # aggregate-first: project in epilogue (f32)
            r = jnp.dot(r, w_ref[...], preferred_element_type=jnp.float32)
        r = r + bias_ref[...]
        if apply_relu:
            r = jnp.maximum(r, 0.0)
        out_ref[...] = r.astype(out_ref.dtype)


def _aggregate(adj_bf16, x_bf16, dstn_p, bias_p, w_p, *, tile_n, apply_relu):
    n_pad = adj_bf16.shape[0]
    fx_pad = x_bf16.shape[1]
    project = w_p is not None
    f_out_pad = w_p.shape[1] if project else fx_pad

    in_specs = [
        pl.BlockSpec((tile_n, tile_n), lambda i, k: (i, k)),   # adj tile (dst rows, src cols)
        pl.BlockSpec((tile_n, fx_pad), lambda i, k: (k, 0)),   # src feature rows
        pl.BlockSpec((tile_n, 1), lambda i, k: (i, 0)),        # dst norm
    ]
    inputs = [adj_bf16, x_bf16, dstn_p]
    if project:
        in_specs.append(pl.BlockSpec((fx_pad, f_out_pad), lambda i, k: (0, 0)))
        inputs.append(w_p)
    in_specs.append(pl.BlockSpec((1, f_out_pad), lambda i, k: (0, 0)))
    inputs.append(bias_p)

    flops = 2 * n_pad * n_pad * fx_pad
    if project:
        flops += 2 * n_pad * fx_pad * f_out_pad
    bytes_accessed = (2 * n_pad * n_pad + 2 * n_pad * fx_pad
                      + 4 * n_pad * f_out_pad + 8 * n_pad + 4 * f_out_pad)

    kernel = functools.partial(_agg_kernel, project=project, apply_relu=apply_relu)
    return pl.pallas_call(
        kernel,
        out_shape=jax.ShapeDtypeStruct((n_pad, f_out_pad), jnp.float32),
        grid=(n_pad // tile_n, n_pad // tile_n),
        in_specs=in_specs,
        out_specs=pl.BlockSpec((tile_n, f_out_pad), lambda i, k: (i, 0)),
        scratch_shapes=[pltpu.VMEM((tile_n, fx_pad), jnp.float32)],
        compiler_params=pltpu.CompilerParams(
            dimension_semantics=("parallel", "arbitrary"),
            vmem_limit_bytes=32 * 1024 * 1024),
        cost_estimate=pl.CostEstimate(flops=flops, transcendentals=0,
                                      bytes_accessed=bytes_accessed),
    )(*inputs)


# ---------------------------------------------------------------------------
# Wrapper
# ---------------------------------------------------------------------------
def graph_conv(adj, feat, weight, bias, *, norm=True, activation='relu',
               tile_n=256):
    """Pallas-backed GraphConv forward (matches the PyTorch module semantics)."""
    if norm not in (True, 'both', 'right'):
        raise Exception('Invalid norm value. Must be either "none", "both" or '
                        '"right". But got "{}".'.format(norm))
    n = adj.shape[0]
    f_in = feat.shape[1]
    f_out = weight.shape[1]
    weight_first = f_in > f_out
    apply_relu = (activation == 'relu')

    # Prologue: degree reductions / norms on the un-padded adjacency, hoisted
    # out of the tiled kernel body (they cannot be computed from a (TM,TK) tile).
    deg_in = jnp.maximum(jnp.sum(adj, axis=1, keepdims=True), 1.0)    # [N,1] dst in-degree
    deg_out = jnp.maximum(jnp.sum(adj, axis=0, keepdims=True), 1.0)   # [1,N] src out-degree
    if norm in (True, 'both'):
        src_norm = jax.lax.rsqrt(deg_out)
        dst_norm = jax.lax.rsqrt(deg_in)
    else:  # 'right' -> mean over in-edges
        src_norm = jnp.ones_like(deg_out)
        dst_norm = 1.0 / deg_in
    src_norm = src_norm.reshape(n, 1)

    # Padding: rows to the tile size, feature dims to lane-dense multiples of 128.
    tile_n = min(tile_n, _round_up(n, 128))
    n_pad = _round_up(n, tile_n)
    f_in_pad = _round_up(f_in, 128)
    f_out_pad = _round_up(f_out, 128)

    adj_p = jnp.pad(adj, ((0, n_pad - n), (0, n_pad - n))).astype(jnp.bfloat16)
    dstn_p = jnp.pad(dst_norm, ((0, n_pad - n), (0, 0)), constant_values=1.0)
    srcn_p = jnp.pad(src_norm, ((0, n_pad - n), (0, 0)), constant_values=1.0)
    w_p = jnp.pad(weight, ((0, f_in_pad - f_in), (0, f_out_pad - f_out)))
    bias_p = jnp.pad(bias.reshape(1, f_out), ((0, 0), (0, f_out_pad - f_out)))

    if weight_first:
        # Project once (own kernel), fold src norm into h, then aggregate.
        feat_p = jnp.pad(feat, ((0, n_pad - n), (0, f_in_pad - f_in)))
        h = _project(feat_p, w_p, srcn_p, tile_n=tile_n)        # bf16 [n_pad, f_out_pad]
        out_p = _aggregate(adj_p, h, dstn_p, bias_p, None,
                           tile_n=tile_n, apply_relu=apply_relu)
    else:
        # Fold src norm into the feature rows, aggregate, project in the epilogue.
        feat_s = jnp.pad(feat * src_norm, ((0, n_pad - n), (0, f_in_pad - f_in)))
        out_p = _aggregate(adj_p, feat_s.astype(jnp.bfloat16), dstn_p, bias_p, w_p,
                           tile_n=tile_n, apply_relu=apply_relu)

    return out_p[:n, :f_out]


def graph_conv_ref(adj, feat, weight, bias, *, norm=True, activation='relu'):
    """Pure-JAX f32 reference for correctness checking."""
    deg_in = jnp.maximum(adj.sum(axis=1, keepdims=True), 1.0)
    deg_out = jnp.maximum(adj.sum(axis=0, keepdims=True), 1.0)
    if norm in (True, 'both'):
        src_norm = deg_out ** -0.5
        dst_norm = deg_in ** -0.5
    else:
        src_norm = jnp.ones_like(deg_out)
        dst_norm = 1.0 / deg_in
    adj_n = adj * src_norm
    if feat.shape[1] > weight.shape[1]:
        rst = (adj_n @ (feat @ weight)) * dst_norm
    else:
        rst = ((adj_n @ feat) * dst_norm) @ weight
    rst = rst + bias.reshape(1, -1)
    if activation == 'relu':
        rst = jnp.maximum(rst, 0.0)
    return rst


def glorot_uniform(key, f_in, f_out):
    bound = (6.0 / (f_in + f_out)) ** 0.5
    return jax.random.uniform(key, (f_in, f_out), jnp.float32, -bound, bound)


if __name__ == "__main__":
    key = jax.random.PRNGKey(0)
    k_adj, k_feat, k_w1, k_w2 = jax.random.split(key, 4)

    N = 64
    # Random sparse-ish graph as a dense adjacency (plus self loops).
    adj = jax.random.bernoulli(k_adj, 0.2, (N, N)).astype(jnp.float32)
    adj = jnp.maximum(adj, jnp.eye(N, dtype=jnp.float32))

    # bf16 MXU operands (f32 accumulation) -> compare vs f32 reference with a
    # correspondingly loosened tolerance.
    ATOL = RTOL = 5e-2
    ok = True

    # Branch 1: in_feats > out_feats (project with W first, then aggregate).
    f_in, f_out = 32, 16
    feat = jax.random.normal(k_feat, (N, f_in), jnp.float32)
    w1 = glorot_uniform(k_w1, f_in, f_out)
    b1 = jnp.zeros((f_out,), jnp.float32)      # bias init is zeros (reset_parameters)
    out1 = jax.block_until_ready(graph_conv(adj, feat, w1, b1, norm=True,
                                            activation='relu'))
    ref1 = graph_conv_ref(adj, feat, w1, b1, norm=True, activation='relu')
    ok &= bool(jnp.allclose(out1, ref1, atol=ATOL, rtol=RTOL))

    # Branch 2: in_feats <= out_feats (aggregate first, then project).
    f_in2, f_out2 = 16, 32
    feat2 = feat[:, :f_in2]
    w2 = glorot_uniform(k_w2, f_in2, f_out2)
    b2 = jnp.zeros((f_out2,), jnp.float32)
    out2 = jax.block_until_ready(graph_conv(adj, feat2, w2, b2, norm=True,
                                            activation='relu'))
    ref2 = graph_conv_ref(adj, feat2, w2, b2, norm=True, activation='relu')
    ok &= bool(jnp.allclose(out2, ref2, atol=ATOL, rtol=RTOL))

    assert ok, "Pallas GraphConv output mismatch vs reference"
    print("KERNEL_OK")
</pallas_src>

<mosaic_0001>
module attributes {stable_mosaic.version = 11 : i64} {
  func.func @_proj_kernel(%arg0: i32, %arg1: memref<128x128xf32, #tpu.memory_space<vmem>>, %arg2: memref<128x128xf32, #tpu.memory_space<vmem>>, %arg3: memref<128x1xf32, #tpu.memory_space<vmem>>, %arg4: memref<128x128xbf16, #tpu.memory_space<vmem>>) attributes {dimension_semantics = [#tpu.dimension_semantics<parallel>], iteration_bounds = array<i64: 1>, scalar_prefetch = 0 : i64, scratch_operands = 0 : i64, tpu.core_type = #tpu.core_type<tc>, window_params = [{transform_indices = @transform_0, window_bounds = array<i64: 128, 128>}, {pipeline_mode = #tpu.pipeline_mode<synchronous>, transform_indices = @transform_1, window_bounds = array<i64: 128, 128>}, {transform_indices = @transform_2, window_bounds = array<i64: 128, 1>}, {transform_indices = @transform_3, window_bounds = array<i64: 128, 128>}]} {
    %c0 = arith.constant 0 : index
    %c0_0 = arith.constant 0 : index
    %0 = vector.load %arg1[%c0, %c0_0] : memref<128x128xf32, #tpu.memory_space<vmem>>, vector<128x128xf32>
    %c0_1 = arith.constant 0 : index
    %c0_2 = arith.constant 0 : index
    %1 = vector.load %arg2[%c0_1, %c0_2] : memref<128x128xf32, #tpu.memory_space<vmem>>, vector<128x128xf32>
    %cst = arith.constant dense<0.000000e+00> : vector<128x128xf32>
    %2 = tpu.matmul %0, %1, %cst {dimension_numbers = #tpu.dot_dimension_numbers<[1], [0], [0], [1], [0, 0, 1, 1], [], []>} : vector<128x128xf32>, vector<128x128xf32>, vector<128x128xf32> -> vector<128x128xf32>
    %c0_3 = arith.constant 0 : index
    %c0_4 = arith.constant 0 : index
    %3 = vector.load %arg3[%c0_3, %c0_4] : memref<128x1xf32, #tpu.memory_space<vmem>>, vector<128x1xf32>
    %4 = vector.broadcast %3 : vector<128x1xf32> to vector<128x128xf32>
    %5 = arith.mulf %2, %4 : vector<128x128xf32>
    %6 = arith.truncf %5 : vector<128x128xf32> to vector<128x128xbf16>
    %c0_5 = arith.constant 0 : index
    %c0_6 = arith.constant 0 : index
    %7 = vector.load %arg4[%c0_5, %c0_6] : memref<128x128xbf16, #tpu.memory_space<vmem>>, vector<128x128xbf16>
    tpu.vector_store %arg4[%c0_5, %c0_6], %6 {strides = array<i32>} : memref<128x128xbf16, #tpu.memory_space<vmem>>, vector<128x128xbf16>,
    return
  }
  func.func @transform_0(%arg0: i32) -> (i32, i32) {
    %c0_i32 = arith.constant 0 : i32
    %c0_i32_0 = arith.constant 0 : i32
    return %arg0, %c0_i32 : i32, i32
  }
  func.func @transform_1(%arg0: i32) -> (i32, i32) {
    %c0_i32 = arith.constant 0 : i32
    %c0_i32_0 = arith.constant 0 : i32
    %c0_i32_1 = arith.constant 0 : i32
    return %c0_i32, %c0_i32_0 : i32, i32
  }
  func.func @transform_2(%arg0: i32) -> (i32, i32) {
    %c0_i32 = arith.constant 0 : i32
    %c0_i32_0 = arith.constant 0 : i32
    return %arg0, %c0_i32 : i32, i32
  }
  func.func @transform_3(%arg0: i32) -> (i32, i32) {
    %c0_i32 = arith.constant 0 : i32
    %c0_i32_0 = arith.constant 0 : i32
    return %arg0, %c0_i32 : i32, i32
  }
}

</mosaic_0001>

<bundles_post_ra>
// kernel: tpu_custom_call.1
= control target key start
LH: loop header
LB: loop body
LE: loop exit
PB: predicated region body
PF: predicated region fallthrough
CT: control target
= control target key end

     0   :  { %8 = vsyncpa [#allocation3], 0  ;;  %s577_s0 = inlined_call_operand.vmem [shape: f32[128,128], index: 0, kind: input, shape index: {}]   ;;  %s578_s1 = inlined_call_operand.hbm [shape: f32[128,128], index: 1, kind: input, shape index: {}]   ;;  %s579_s2 = inlined_call_operand.vmem [shape: f32[128,1], index: 2, kind: input, shape index: {}]   ;;  %s580_s3 = inlined_call_operand.hbm [shape: bf16[128,128], index: 3, kind: output, shape index: {}]  }
   0x1   :  { %9 = vsyncpa [#allocation4], 0  ;;  %s16_s14 = sshll.u32 %s578_s1, 4  ;;  %s448_s15 = smov [#allocation2]   ;;  %s17_s14 = int_to_ptr.hbm [resolvable:$true] %s16_s14 }
   0x2   :  { %s18_s16 = sshll.u32 %s448_s15, 4  ;;  %s449_s17 = smov 128   ;;  %s19_s16 = int_to_ptr.vmem [resolvable:$true] %s18_s16 }
   0x3   :  { %s450_s18 = smov 8  }
   0x4   :  { %24 = dma.hbm_to_vmem [thread:$0]  %s17_s14, 2048, %s19_s16, [#allocation3], %s449_s17, %s449_s17, %s450_s18  }
   0x5   :  { %444 = dma.done.wait [#allocation3], 2048  }
   0x6   :  { %445 = vsyncadd [#allocation3], 4294965248  ;;  %v451_v0 = vmov 0   ;;  %v128_v1 = vld [vmem:[%s579_s2] sm:$0xff]  ;;  %v62_v2 = vld [vmem:[#allocation2 + $0x78] sm:$0xff]  ;;  %s278_s28 = sshll.u32 %s580_s3, 4  ;;  %s279_s28 = int_to_ptr.hbm [resolvable:$true] %s278_s28 }
   0x7   :  { %393 = vset.pattern.permute.xlu0 %v451_v0  ;;  %394 = vset.pattern.permute.xlu1 %v451_v0  ;;  %v61_v3 = vld [vmem:[#allocation2 + $0x70] sm:$0xff]  ;;  %v60_v4 = vld [vmem:[#allocation2 + $0x68] sm:$0xff]  ;;  %v59_v5 = vld [vmem:[#allocation2 + $0x60] sm:$0xff]  ;;  %s453_s29 = smov 64   ;;  %s454_s30 = smov 4  }
   0x8   :  { %395 = vset.pattern.permute.xlu2 %v451_v0  ;;  %146 = vperm.xlu0 %393, %v128_v1   ;;  %v130_v6 = vld [vmem:[%s579_s2 + $0x10] sm:$0xff]  ;;  %v129_v7 = vld [vmem:[%s579_s2 + $0x8] sm:$0xff]  ;;  %v58_v8 = vld [vmem:[#allocation2 + $0x58] sm:$0xff] }
   0x9   :  { %63 = vmatpush.msra.mxu0 %v62_v2  ;;  %338 = vmatpush.msra.mxu1 %v62_v2  ;;  %v57_v9 = vld [vmem:[#allocation2 + $0x50] sm:$0xff]  ;;  %v56_v10 = vld [vmem:[#allocation2 + $0x48] sm:$0xff]  ;;  %v55_v11 = vld [vmem:[#allocation2 + $0x40] sm:$0xff] }
   0xa   :  { %339 = vmatpush.msra.mxu2 %v62_v2  ;;  %340 = vmatpush.msra.mxu3 %v62_v2  ;;  %v131_v12 = vld [vmem:[%s579_s2 + $0x18] sm:$0xff]  ;;  %v134_v13 = vld [vmem:[%s579_s2 + $0x30] sm:$0xff]  ;;  %v52_v16 = vld [vmem:[#allocation2 + $0x28] sm:$0xff] }
   0xb   :  { %64 = vmatpush.msra.mxu0 %v61_v3  ;;  %341 = vmatpush.msra.mxu1 %v61_v3  ;;  %v54_v14 = vld [vmem:[#allocation2 + $0x38] sm:$0xff]  ;;  %v53_v15 = vld [vmem:[#allocation2 + $0x30] sm:$0xff]  ;;  %v51_v17 = vld [vmem:[#allocation2 + $0x20] sm:$0xff] }
   0xc   :  { %342 = vmatpush.msra.mxu2 %v61_v3  ;;  %343 = vmatpush.msra.mxu3 %v61_v3  ;;  %v135_v18 = vld [vmem:[%s579_s2 + $0x38] sm:$0xff]  ;;  %v137_v19 = vld [vmem:[%s579_s2 + $0x48] sm:$0xff]  ;;  %v49_v21 = vld [vmem:[#allocation2 + $0x10] sm:$0xff] }
   0xd   :  { %65 = vmatpush.msra.mxu0 %v60_v4  ;;  %344 = vmatpush.msra.mxu1 %v60_v4  ;;  %v50_v20 = vld [vmem:[#allocation2 + $0x18] sm:$0xff]  ;;  %v48_v22 = vld [vmem:[#allocation2 + $0x8] sm:$0xff]  ;;  %v47_v23 = vld [vmem:[#allocation2] sm:$0xff] }
   0xe   :  { %345 = vmatpush.msra.mxu2 %v60_v4  ;;  %346 = vmatpush.msra.mxu3 %v60_v4  ;;  %v31_v24 = vld [vmem:[%s577_s0] sm:$0xff]  ;;  %v138_v29 = vld [vmem:[%s579_s2 + $0x50] sm:$0xff]  ;;  %v32_v31 = vld [vmem:[%s577_s0 + $0x8] sm:$0xff] }
   0xf   :  { %66 = vmatpush.msra.mxu0 %v59_v5  ;;  %347 = vmatpush.msra.mxu1 %v59_v5  ;;  %v35_v25 = vld [vmem:[%s577_s0 + $0x20] sm:$0xff]  ;;  %v36_v32 = vld [vmem:[%s577_s0 + $0x28] sm:$0xff]  ;;  %v143_v37 = vld [vmem:[%s579_s2 + $0x78] sm:$0xff] }
  0x10   :  { %348 = vmatpush.msra.mxu2 %v59_v5  ;;  %349 = vmatpush.msra.mxu3 %v59_v5  ;;  %v39_v26 = vld [vmem:[%s577_s0 + $0x40] sm:$0xff]  ;;  %v40_v33 = vld [vmem:[%s577_s0 + $0x48] sm:$0xff]  ;;  %v33_v38 = vld [vmem:[%s577_s0 + $0x10] sm:$0xff] }
  0x11   :  { %156 = vperm.xlu1 %394, %v130_v6   ;;  %151 = vperm.xlu0 %393, %v129_v7   ;;  %v43_v27 = vld [vmem:[%s577_s0 + $0x60] sm:$0xff]  ;;  %v44_v34 = vld [vmem:[%s577_s0 + $0x68] sm:$0xff]  ;;  %v37_v39 = vld [vmem:[%s577_s0 + $0x30] sm:$0xff] }
  0x12   :  { %67 = vmatpush.msra.mxu0 %v58_v8  ;;  %350 = vmatpush.msra.mxu1 %v58_v8  ;;  %v132_v28 = vld [vmem:[%s579_s2 + $0x20] sm:$0xff]  ;;  %v133_v35 = vld [vmem:[%s579_s2 + $0x28] sm:$0xff]  ;;  %v41_v40 = vld [vmem:[%s577_s0 + $0x50] sm:$0xff] }
  0x13   :  { %351 = vmatpush.msra.mxu2 %v58_v8  ;;  %352 = vmatpush.msra.mxu3 %v58_v8  ;;  %v140_v30 = vld [vmem:[%s579_s2 + $0x60] sm:$0xff]  ;;  %v141_v36 = vld [vmem:[%s579_s2 + $0x68] sm:$0xff]  ;;  %v45_v41 = vld [vmem:[%s577_s0 + $0x70] sm:$0xff] }
  0x14   :  { %68 = vmatpush.msra.mxu0 %v57_v9  ;;  %353 = vmatpush.msra.mxu1 %v57_v9  ;;  %v136_v42 = vld [vmem:[%s579_s2 + $0x40] sm:$0xff]  ;;  %v34_v43 = vld [vmem:[%s577_s0 + $0x18] sm:$0xff]  ;;  %v142_v48 = vld [vmem:[%s579_s2 + $0x70] sm:$0xff] }
  0x15   :  { %354 = vmatpush.msra.mxu2 %v57_v9  ;;  %355 = vmatpush.msra.mxu3 %v57_v9  ;;  %v38_v44 = vld [vmem:[%s577_s0 + $0x38] sm:$0xff] }
  0x16   :  { %69 = vmatpush.msra.mxu0 %v56_v10  ;;  %356 = vmatpush.msra.mxu1 %v56_v10  ;;  %v42_v45 = vld [vmem:[%s577_s0 + $0x58] sm:$0xff] }
  0x17   :  { %357 = vmatpush.msra.mxu2 %v56_v10  ;;  %358 = vmatpush.msra.mxu3 %v56_v10  ;;  %v46_v46 = vld [vmem:[%s577_s0 + $0x78] sm:$0xff]  ;;  %s452_s0 = smov [#allocation5]  }
  0x18   :  { %70 = vmatpush.msra.mxu0 %v55_v11  ;;  %359 = vmatpush.msra.mxu1 %v55_v11  ;;  %v139_v47 = vld [vmem:[%s579_s2 + $0x58] sm:$0xff]  ;;  %s276_s2 = sshll.u32 %s452_s0, 4  ;;  %s277_s2 = int_to_ptr.vmem [resolvable:$true] %s276_s2 }
  0x19   :  { %360 = vmatpush.msra.mxu2 %v55_v11  ;;  %361 = vmatpush.msra.mxu3 %v55_v11 }
  0x1a   :  { %161 = vperm.xlu1 %394, %v131_v12   ;;  %176 = vperm.xlu0 %393, %v134_v13  }
  0x1b   :  { %71 = vmatpush.msra.mxu0 %v54_v14  ;;  %362 = vmatpush.msra.mxu1 %v54_v14 }
  0x1c   :  { %363 = vmatpush.msra.mxu2 %v54_v14  ;;  %364 = vmatpush.msra.mxu3 %v54_v14 }
  0x1d   :  { %72 = vmatpush.msra.mxu0 %v53_v15  ;;  %365 = vmatpush.msra.mxu1 %v53_v15 }
  0x1e   :  { %366 = vmatpush.msra.mxu2 %v53_v15  ;;  %367 = vmatpush.msra.mxu3 %v53_v15 }
  0x1f   :  { %73 = vmatpush.msra.mxu0 %v52_v16  ;;  %368 = vmatpush.msra.mxu1 %v52_v16 }
  0x20   :  { %369 = vmatpush.msra.mxu2 %v52_v16  ;;  %370 = vmatpush.msra.mxu3 %v52_v16 }
  0x21   :  { %74 = vmatpush.msra.mxu0 %v51_v17  ;;  %371 = vmatpush.msra.mxu1 %v51_v17 }
  0x22   :  { %372 = vmatpush.msra.mxu2 %v51_v17  ;;  %373 = vmatpush.msra.mxu3 %v51_v17 }
  0x23   :  { %181 = vperm.xlu1 %394, %v135_v18   ;;  %191 = vperm.xlu0 %393, %v137_v19  }
  0x24   :  { %75 = vmatpush.msra.mxu0 %v50_v20  ;;  %374 = vmatpush.msra.mxu1 %v50_v20 }
  0x25   :  { %375 = vmatpush.msra.mxu2 %v50_v20  ;;  %376 = vmatpush.msra.mxu3 %v50_v20 }
  0x26   :  { %76 = vmatpush.msra.mxu0 %v49_v21  ;;  %377 = vmatpush.msra.mxu1 %v49_v21 }
  0x27   :  { %378 = vmatpush.msra.mxu2 %v49_v21  ;;  %379 = vmatpush.msra.mxu3 %v49_v21 }
  0x28   :  { %77 = vmatpush.msra.mxu0 %v48_v22  ;;  %380 = vmatpush.msra.mxu1 %v48_v22 }
  0x29   :  { %381 = vmatpush.msra.mxu2 %v48_v22  ;;  %382 = vmatpush.msra.mxu3 %v48_v22 }
  0x2a   :  { %78 = vmatpush.msra.mxu0 %v47_v23  ;;  %383 = vmatpush.msra.mxu1 %v47_v23 }
  0x2b   :  { %384 = vmatpush.msra.mxu2 %v47_v23  ;;  %385 = vmatpush.msra.mxu3 %v47_v23 }
  0x2c   :  { %79 = vmatmul.f32.vlgmr.msra.gmra.mxu0 %v31_v24  ;;  %91 = vmatmul.f32.vlgmr.msra.gmra.mxu1 %v35_v25 }
  0x2d   :  { %103 = vmatmul.f32.vlgmr.msra.gmra.mxu2 %v39_v26  ;;  %115 = vmatmul.f32.vlgmr.msra.gmra.mxu3 %v43_v27 }
  0x2e   :  { %166 = vperm.xlu2 %395, %v132_v28   ;;  %196 = vperm.xlu1 %394, %v138_v29  }
  0x2f   :  { %206 = vperm.xlu0 %393, %v140_v30  }
  0x34   :  { %82 = vmatmul.f32.gmra.mxu0 %v32_v31  ;;  %94 = vmatmul.f32.gmra.mxu1 %v36_v32 }
  0x35   :  { %106 = vmatmul.f32.gmra.mxu2 %v40_v33  ;;  %118 = vmatmul.f32.gmra.mxu3 %v44_v34 }
  0x36   :  { %171 = vperm.xlu2 %395, %v133_v35   ;;  %211 = vperm.xlu1 %394, %v141_v36  }
  0x37   :  { %221 = vperm.xlu0 %393, %v143_v37  }
  0x3c   :  { %85 = vmatmul.f32.gmra.mxu0 %v33_v38  ;;  %97 = vmatmul.f32.gmra.mxu1 %v37_v39 }
  0x3d   :  { %109 = vmatmul.f32.gmra.mxu2 %v41_v40  ;;  %121 = vmatmul.f32.gmra.mxu3 %v45_v41 }
  0x3e   :  { %186 = vperm.xlu2 %395, %v136_v42  }
  0x44   :  { %88 = vmatmul.f32.gmra.mxu0 %v34_v43  ;;  %100 = vmatmul.f32.gmra.mxu1 %v38_v44 }
  0x45   :  { %112 = vmatmul.f32.gmra.mxu2 %v42_v45  ;;  %124 = vmatmul.f32.gmra.mxu3 %v46_v46 }
  0x46   :  { %201 = vperm.xlu2 %395, %v139_v47  }
  0x4e   :  { %216 = vperm.xlu2 %395, %v142_v48  }
  0x7a   :  { %v147_v49 = vpop.permute.xlu0 %146 }
  0x83   :  { %v157_v50 = vpop.permute.xlu1 %156  ;;  %v152_v51 = vpop.permute.xlu0 %151 }
  0x88   :  { %v167_v53 = vpop.permute.xlu2 %166 }
  0x8c   :  { %v162_v52 = vpop.permute.xlu1 %161  ;;  %v177_v54 = vpop.permute.xlu0 %176 }
  0x90   :  { %v172_v56 = vpop.permute.xlu2 %171 }
  0x95   :  { %v182_v55 = vpop.permute.xlu1 %181  ;;  %v192_v59 = vpop.permute.xlu0 %191 }
  0x98   :  { %v187_v5 = vpop.permute.xlu2 %186 }
  0xa0   :  { %v197_v60 = vpop.permute.xlu1 %196  ;;  %v202_v20 = vpop.permute.xlu2 %201 }
  0xa1   :  { %v207_v8 = vpop.permute.xlu0 %206 }
  0xa8   :  { %v212_v10 = vpop.permute.xlu1 %211  ;;  %v217_v31 = vpop.permute.xlu2 %216 }
  0xa9   :  { %v80_v57 = vpop.f32.mrf.mxu0  ;;  %v92_v58 = vpop.f32.mrf.mxu1 }
  0xaa   :  { %v224_v1 = vmul.f32 %v147_v49, %v80_v57  ;;  %v228_v2 = vmul.f32 %v167_v53, %v92_v58  ;;  %v222_v33 = vpop.permute.xlu0 %221 }
  0xb0   :  { %v104_v61 = vpop.f32.mrf.mxu2  ;;  %v116_v62 = vpop.f32.mrf.mxu3 }
  0xb1   :  { %v83_v63 = vpop.f32.mrf.mxu0  ;;  %v95_v0 = vpop.f32.mrf.mxu1  ;;  %v232_v11 = vmul.f32 %v187_v5, %v104_v61  ;;  %v236_v14 = vmul.f32 %v207_v8, %v116_v62 }
  0xb2   :  { %v225_v3 = vmul.f32 %v152_v51, %v83_v63  ;;  %v229_v4 = vmul.f32 %v172_v56, %v95_v0 }
  0xb4   :  { %v294_v6 = vpack.c.bf16 %v225_v3, %v224_v1  ;;  %v304_v7 = vpack.c.bf16 %v229_v4, %v228_v2 }
  0xb6   :  { %295 = vst [vmem:[#allocation5] sm:$0xff] %v294_v6  }
  0xb7   :  { %332 = vst [vmem:[#allocation5 + $0x10] sm:$0xff] %v304_v7  }
  0xb8   :  { %v107_v9 = vpop.f32.mrf.mxu2  ;;  %v119_v13 = vpop.f32.mrf.mxu3 }
  0xb9   :  { %v233_v12 = vmul.f32 %v192_v59, %v107_v9  ;;  %v237_v15 = vmul.f32 %v212_v10, %v119_v13  ;;  %v86_v16 = vpop.f32.mrf.mxu0  ;;  %v98_v17 = vpop.f32.mrf.mxu1 }
  0xba   :  { %v226_v25 = vmul.f32 %v157_v50, %v86_v16  ;;  %v230_v26 = vmul.f32 %v177_v54, %v98_v17 }
  0xbb   :  { %v314_v18 = vpack.c.bf16 %v233_v12, %v232_v11  ;;  %v324_v19 = vpack.c.bf16 %v237_v15, %v236_v14 }
  0xbd   :  { %334 = vst [vmem:[#allocation5 + $0x20] sm:$0xff] %v314_v18  }
  0xbe   :  { %336 = vst [vmem:[#allocation5 + $0x30] sm:$0xff] %v324_v19  }
  0xc0   :  { %v110_v21 = vpop.f32.mrf.mxu2  ;;  %v122_v22 = vpop.f32.mrf.mxu3 }
  0xc1   :  { %v89_v23 = vpop.f32.mrf.mxu0  ;;  %v101_v24 = vpop.f32.mrf.mxu1  ;;  %v234_v34 = vmul.f32 %v197_v60, %v110_v21  ;;  %v238_v37 = vmul.f32 %v217_v31, %v122_v22 }
  0xc2   :  { %v227_v27 = vmul.f32 %v162_v52, %v89_v23  ;;  %v231_v28 = vmul.f32 %v182_v55, %v101_v24 }
  0xc4   :  { %v299_v29 = vpack.c.bf16 %v227_v27, %v226_v25  ;;  %v309_v30 = vpack.c.bf16 %v231_v28, %v230_v26 }
  0xc6   :  { %331 = vst [vmem:[#allocation5 + $0x8] sm:$0xff] %v299_v29  }
  0xc7   :  { %333 = vst [vmem:[#allocation5 + $0x18] sm:$0xff] %v309_v30  }
  0xc8   :  { %v113_v32 = vpop.f32.mrf.mxu2  ;;  %v125_v36 = vpop.f32.mrf.mxu3 }
  0xc9   :  { %v235_v35 = vmul.f32 %v202_v20, %v113_v32  ;;  %v239_v38 = vmul.f32 %v222_v33, %v125_v36 }
  0xcb   :  { %v319_v39 = vpack.c.bf16 %v235_v35, %v234_v34  ;;  %v329_v40 = vpack.c.bf16 %v239_v38, %v238_v37 }
  0xcd   :  { %335 = vst [vmem:[#allocation5 + $0x28] sm:$0xff] %v319_v39  }
  0xce   :  { %337 = vst [vmem:[#allocation5 + $0x38] sm:$0xff] %v329_v40  }
  0xcf   :  { %284 = dma.vmem_to_hbm [thread:$0]  %s277_s2, 1024, %s279_s28, [#allocation4], %s453_s29, %s453_s29, %s454_s30  }
  0xd0   :  { %446 = dma.done.wait [#allocation4], 1024  }
  0xd1   :  { %447 = vsyncadd [#allocation4], 4294966272 }
  0xd2   :  { %289 = vsyncpa [#allocation3], 1 }
  0xd3   :  { %290 = vsyncpa [#allocation4], 1 }

</bundles_post_ra>
